<compile_context>
chip_gen: v7x
topology: tpu7x:2x2x1
jax: 0.10.0
libtpu: 0.0.40
codegen_flags: <defaults>
</compile_context>

<pallas_src>
import functools

import jax
import jax.numpy as jnp
from jax.experimental import pallas as pl
from jax.experimental.pallas import tpu as pltpu

EPS = 1e-5


# ---------------------------------------------------------------------------
# Pass 1: per-graph partial moments  part[P, B, 3] = (sum x, sum x^2, count)
# ---------------------------------------------------------------------------
def _stats_kernel(*refs, n, tn, sub, tiles_per_part, num_graphs):
    if num_graphs == 1:
        x_ref, part_ref = refs
        ids_ref = None
    else:
        ids_ref, x_ref, part_ref = refs

    p = pl.program_id(0)
    t = pl.program_id(1)

    @pl.when(t == 0)
    def _():
        part_ref[...] = jnp.zeros_like(part_ref)

    base = (p * tiles_per_part + t) * tn            # first node row of this tile
    acc = jnp.zeros((num_graphs, 3), jnp.float32)

    start = 0
    while start < tn:                               # static sub-block loop
        size = min(sub, tn - start)
        xr = x_ref[start:start + size, :].astype(jnp.float32)
        rows = base + start + jax.lax.broadcasted_iota(jnp.int32, (size, 1), 0)
        valid = rows < n                            # mask ragged / clamped tiles
        rs = jnp.where(valid, jnp.sum(xr, axis=1, keepdims=True), 0.0)
        rq = jnp.where(valid, jnp.sum(xr * xr, axis=1, keepdims=True), 0.0)
        cnt = valid.astype(jnp.float32)
        stacked = jnp.concatenate([rs, rq, cnt], axis=1)          # [size, 3]
        if num_graphs == 1:
            acc = acc + jnp.sum(stacked, axis=0, keepdims=True)
        else:
            ids_j = ids_ref[:, start:start + size]                 # [1, size]
            iota_b = jax.lax.broadcasted_iota(jnp.int32, (num_graphs, size), 0)
            oh = (iota_b == ids_j).astype(jnp.float32)             # [B, size]
            acc = acc + jnp.dot(oh, stacked, preferred_element_type=jnp.float32)
        start += size

    part_ref[0, :, :] += acc


# ---------------------------------------------------------------------------
# Pass 2: out = x * scale[batch] + shift[batch]   (optionally fused ReLU)
# ---------------------------------------------------------------------------
def _apply_kernel(*refs, c, tn, sub, num_graphs, fuse_relu):
    if num_graphs == 1:
        x_ref, ss_ref, o_ref = refs
        ids_ref = None
    else:
        ids_ref, x_ref, ss_ref, o_ref = refs

    ss = ss_ref[...]                                # [B, 2C] f32, VMEM resident

    if num_graphs == 1:                             # no one-hot, plain broadcast
        y = x_ref[...].astype(jnp.float32) * ss[:, :c] + ss[:, c:]
        if fuse_relu:
            y = jnp.maximum(y, 0.0)
        o_ref[...] = y.astype(o_ref.dtype)
        return

    start = 0
    while start < tn:                               # static sub-block loop
        size = min(sub, tn - start)
        xr = x_ref[start:start + size, :].astype(jnp.float32)
        ids_j = ids_ref[start:start + size, :]                     # [size, 1]
        iota_b = jax.lax.broadcasted_iota(jnp.int32, (size, num_graphs), 1)
        oh = (ids_j == iota_b).astype(jnp.float32)                 # [size, B]
        g = jnp.dot(oh, ss, preferred_element_type=jnp.float32)    # [size, 2C]
        y = xr * g[:, :c] + g[:, c:]
        if fuse_relu:
            y = jnp.maximum(y, 0.0)
        o_ref[start:start + size, :] = y.astype(o_ref.dtype)
        start += size


# ---------------------------------------------------------------------------
# Tiling / VMEM budget (per-generation: v7x has 64 MiB VMEM, v5e/v6e 128 MiB)
# ---------------------------------------------------------------------------
def _choose_tiles(n, c, itemsize, num_graphs, node_tile, vmem_limit_bytes):
    try:
        cap = int(getattr(pltpu.get_tpu_info(), "vmem_capacity_bytes",
                          128 * 1024 * 1024))
    except Exception:
        cap = 128 * 1024 * 1024
    if vmem_limit_bytes is None:
        vmem_limit_bytes = min(64 * 1024 * 1024, (3 * cap) // 4)
    tn = max(256, (int(node_tile) // 256) * 256)
    budget = (6 * int(vmem_limit_bytes)) // 10

    def footprint(t):   # pass-2 dominates: dbl-buffered x, out, ids + scale/shift
        return (2 * (t * c * itemsize + t * c * itemsize + t * 4)
                + 2 * (num_graphs * 2 * c * 4))

    while tn > 256 and footprint(tn) > budget:
        tn //= 2
    if n < tn:
        tn = n          # single tile; full-extent block is always legal
    sub = 256 if tn > 256 else tn
    return tn, sub, int(vmem_limit_bytes)


# ---------------------------------------------------------------------------
# Public wrapper
# ---------------------------------------------------------------------------
def graph_layer_norm(x, batch, weight, bias, *, num_graphs=None, eps=EPS,
                     node_tile=1024, stat_splits=2, fuse_relu=False,
                     vmem_limit_bytes=None):
    """Forward of the module's LayerNorm(x, batch). num_graphs must be static."""
    n, c = x.shape
    batch_is_none = batch is None
    if batch_is_none:
        b = 1
    else:
        if num_graphs is None:
            raise ValueError("num_graphs must be given statically when batch is "
                             "provided (avoids a host sync on jnp.max(batch)).")
        b = int(num_graphs)
        batch = batch.astype(jnp.int32)

    itemsize = jnp.dtype(x.dtype).itemsize
    tn, sub, vmem_limit = _choose_tiles(n, c, itemsize, b, node_tile,
                                        vmem_limit_bytes)
    n_tiles = -(-n // tn)

    # ------------------ pass 1: per-graph partial moments ------------------
    p_parts = max(1, min(int(stat_splits), n_tiles))   # v7x: 2 TC-parallel scans
    tiles_per_part = -(-n_tiles // p_parts)

    def x_map1(p, t):
        return (jnp.minimum(p * tiles_per_part + t, n_tiles - 1), 0)

    def ids_map1(p, t):
        return (0, jnp.minimum(p * tiles_per_part + t, n_tiles - 1))

    in_specs1, args1 = [], []
    if b > 1:
        in_specs1.append(pl.BlockSpec((1, tn), ids_map1))
        args1.append(batch.reshape(1, n))
    in_specs1.append(pl.BlockSpec((tn, c), x_map1))
    args1.append(x)

    part = pl.pallas_call(
        functools.partial(_stats_kernel, n=n, tn=tn, sub=sub,
                          tiles_per_part=tiles_per_part, num_graphs=b),
        out_shape=jax.ShapeDtypeStruct((p_parts, b, 3), jnp.float32),
        grid_spec=pltpu.PrefetchScalarGridSpec(
            num_scalar_prefetch=0,
            grid=(p_parts, tiles_per_part),
            in_specs=in_specs1,
            out_specs=pl.BlockSpec((1, b, 3), lambda p, t: (p, 0, 0)),
        ),
        compiler_params=pltpu.CompilerParams(
            dimension_semantics=("parallel", "arbitrary"),
            vmem_limit_bytes=vmem_limit),
    )(*args1)

    # -------- tiny XLA glue: combine partials, fold affine terms ----------
    tot = jnp.sum(part, axis=0)                              # [B, 3]
    s, q, cnt = tot[:, 0], tot[:, 1], tot[:, 2]
    norm = jnp.maximum(cnt, 1.0) * float(c)                  # count_g * C
    mean = s / norm
    var = jnp.maximum(q / norm - mean * mean, 0.0)           # clamp cancellation
    if batch_is_none:
        inv = 1.0 / (jnp.sqrt(var) + eps)                    # torch: / (std + eps)
    else:
        inv = jax.lax.rsqrt(var + eps)                       # torch: / sqrt(var+eps)
    w = jnp.broadcast_to(jnp.asarray(weight, jnp.float32).reshape(-1), (c,))
    bb = jnp.broadcast_to(jnp.asarray(bias, jnp.float32).reshape(-1), (c,))
    scale = w[None, :] * inv[:, None]                        # [B, C]
    shift = bb[None, :] - scale * mean[:, None]              # [B, C]
    ss = jnp.concatenate([scale, shift], axis=1)             # [B, 2C] stacked

    # ------------- pass 2: out = x * scale[g] + shift[g] -------------------
    in_specs2, args2 = [], []
    if b > 1:
        in_specs2.append(pl.BlockSpec((tn, 1), lambda t: (t, 0)))
        args2.append(batch.reshape(n, 1))
    in_specs2.append(pl.BlockSpec((tn, c), lambda t: (t, 0)))
    args2.append(x)
    in_specs2.append(pl.BlockSpec((b, 2 * c), lambda t: (0, 0)))
    args2.append(ss)

    out = pl.pallas_call(
        functools.partial(_apply_kernel, c=c, tn=tn, sub=sub,
                          num_graphs=b, fuse_relu=fuse_relu),
        out_shape=jax.ShapeDtypeStruct((n, c), x.dtype),
        grid_spec=pltpu.PrefetchScalarGridSpec(
            num_scalar_prefetch=0,
            grid=(n_tiles,),
            in_specs=in_specs2,
            out_specs=pl.BlockSpec((tn, c), lambda t: (t, 0)),
        ),
        compiler_params=pltpu.CompilerParams(
            dimension_semantics=("parallel",),
            vmem_limit_bytes=vmem_limit),
    )(*args2)
    return out


# ---------------------------------------------------------------------------
# Pure-JAX reference matching the PyTorch forward exactly.
# ---------------------------------------------------------------------------
def _layer_norm_ref(x, batch, weight, bias, *, num_graphs=None, eps=EPS):
    x = x.astype(jnp.float32)
    if batch is None:
        xc = x - jnp.mean(x)
        return xc / (jnp.std(xc) + eps) * weight + bias
    b = int(num_graphs)
    cnt = jax.ops.segment_sum(jnp.ones((x.shape[0],), jnp.float32), batch,
                              num_segments=b)
    norm = jnp.maximum(cnt, 1.0) * x.shape[-1]
    mean = jax.ops.segment_sum(x, batch, num_segments=b).sum(-1) / norm
    xc = x - mean[batch][:, None]
    var = jax.ops.segment_sum(xc * xc, batch, num_segments=b).sum(-1) / norm
    out = xc / jnp.sqrt(var + eps)[batch][:, None]
    return out * weight + bias


if __name__ == "__main__":
    key = jax.random.PRNGKey(0)

    # Small shapes implied by the module: node features [N, C], 2 graphs.
    N, C = 16, 32
    x = jax.random.normal(key, (N, C), dtype=jnp.float32)
    batch = jnp.array([0] * 8 + [1] * 8, dtype=jnp.int32)
    # reset_parameters(): weight = 1, bias = 0
    weight = jnp.ones((C,), jnp.float32)
    bias = jnp.zeros((C,), jnp.float32)

    y = graph_layer_norm(x, batch, weight, bias, num_graphs=2)
    jax.block_until_ready(y)
    y_ref = _layer_norm_ref(x, batch, weight, bias, num_graphs=2)
    assert jnp.allclose(y, y_ref, atol=2e-4, rtol=2e-4), "mismatch vs reference"

    # Fused ReLU (the module applies ReLU right after LayerNorm).
    y_relu = graph_layer_norm(x, batch, weight, bias, num_graphs=2,
                              fuse_relu=True)
    jax.block_until_ready(y_relu)
    assert jnp.allclose(y_relu, jnp.maximum(y_ref, 0.0), atol=2e-4, rtol=2e-4), \
        "mismatch vs reference (fused relu)"

    # batch=None path (eps added to std per the PyTorch code).
    y0 = graph_layer_norm(x, None, weight, bias)
    jax.block_until_ready(y0)
    y0_ref = _layer_norm_ref(x, None, weight, bias)
    assert jnp.allclose(y0, y0_ref, atol=2e-4, rtol=2e-4), \
        "mismatch vs reference (batch=None)"

    # Multi-tile / ragged-tail / bf16 / 2-way-stats-split path.
    N2, C2, B2 = 600, 128, 5
    k1, k2 = jax.random.split(key)
    x2 = jax.random.normal(k1, (N2, C2), dtype=jnp.float32).astype(jnp.bfloat16)
    batch2 = jnp.sort(jax.random.randint(k2, (N2,), 0, B2)).astype(jnp.int32)
    w2 = jnp.ones((C2,), jnp.float32)
    b2 = jnp.zeros((C2,), jnp.float32)
    y2 = graph_layer_norm(x2, batch2, w2, b2, num_graphs=B2, node_tile=256)
    jax.block_until_ready(y2)
    y2_ref = _layer_norm_ref(x2.astype(jnp.float32), batch2, w2, b2,
                             num_graphs=B2)
    assert jnp.allclose(y2.astype(jnp.float32), y2_ref, atol=3e-2, rtol=3e-2), \
        "mismatch vs reference (bf16 multi-tile)"

    print("KERNEL_OK")
</pallas_src>

<mosaic_0001>
module attributes {stable_mosaic.version = 11 : i64} {
  func.func @_stats_kernel(%arg0: i32, %arg1: i32, %arg2: memref<1x16xi32, #tpu.memory_space<vmem>>, %arg3: memref<16x32xf32, #tpu.memory_space<vmem>>, %arg4: memref<1x2x3xf32, #tpu.memory_space<vmem>>) attributes {dimension_semantics = [#tpu.dimension_semantics<parallel>, #tpu.dimension_semantics<arbitrary>], iteration_bounds = array<i64: 1, 1>, scalar_prefetch = 0 : i64, scratch_operands = 0 : i64, tpu.core_type = #tpu.core_type<tc>, window_params = [{transform_indices = @transform_0, window_bounds = array<i64: 1, 16>}, {transform_indices = @transform_1, window_bounds = array<i64: 16, 32>}, {transform_indices = @transform_2, window_bounds = array<i64: 1, 2, 3>}]} {
    %c0_i32 = arith.constant 0 : i32
    %0 = arith.cmpi eq, %arg1, %c0_i32 : i32
    %1 = arith.extui %0 : i1 to i32
    %c0_i32_0 = arith.constant 0 : i32
    %2 = arith.cmpi ne, %1, %c0_i32_0 : i32
    scf.if %2 {
      %cst_17 = arith.constant 0.000000e+00 : f32
      %40 = vector.broadcast %cst_17 : f32 to vector<1x2x3xf32>
      %c0_18 = arith.constant 0 : index
      %c0_19 = arith.constant 0 : index
      %c0_20 = arith.constant 0 : index
      %41 = vector.load %arg4[%c0_18, %c0_19, %c0_20] : memref<1x2x3xf32, #tpu.memory_space<vmem>>, vector<1x2x3xf32>
      tpu.vector_store %arg4[%c0_18, %c0_19, %c0_20], %40 {strides = array<i32>} : memref<1x2x3xf32, #tpu.memory_space<vmem>>, vector<1x2x3xf32>,
    } else {
    }
    %c1_i32 = arith.constant 1 : i32
    %3 = arith.muli %arg0, %c1_i32 : i32
    %4 = arith.addi %3, %arg1 : i32
    %c16_i32 = arith.constant 16 : i32
    %5 = arith.muli %4, %c16_i32 : i32
    %cst = arith.constant 0.000000e+00 : f32
    %6 = vector.broadcast %cst : f32 to vector<2x3xf32>
    %c0 = arith.constant 0 : index
    %c0_1 = arith.constant 0 : index
    %7 = vector.load %arg3[%c0, %c0_1] : memref<16x32xf32, #tpu.memory_space<vmem>>, vector<16x32xf32>
    %c0_i32_2 = arith.constant 0 : i32
    %8 = arith.addi %5, %c0_i32_2 : i32
    %9 = tpu.iota {dimensions = array<i32: 0>} : vector<16x1xi32>
    %10 = vector.broadcast %8 : i32 to vector<16x1xi32>
    %11 = arith.addi %10, %9 : vector<16x1xi32>
    %c16_i32_3 = arith.constant 16 : i32
    %12 = vector.broadcast %c16_i32_3 : i32 to vector<16x1xi32>
    %13 = arith.cmpi slt, %11, %12 : vector<16x1xi32>
    %cst_4 = arith.constant dense<0.000000e+00> : vector<16xf32>
    %14 = vector.multi_reduction <add>, %7, %cst_4 [1] : vector<16x32xf32> to vector<16xf32>
    %15 = vector.shape_cast %14 : vector<16xf32> to vector<16x1xf32>
    %cst_5 = arith.constant 0.000000e+00 : f32
    %16 = vector.broadcast %cst_5 : f32 to vector<16x1xf32>
    %17 = arith.select %13, %15, %16 : vector<16x1xi1>, vector<16x1xf32>
    %18 = arith.mulf %7, %7 : vector<16x32xf32>
    %cst_6 = arith.constant dense<0.000000e+00> : vector<16xf32>
    %19 = vector.multi_reduction <add>, %18, %cst_6 [1] : vector<16x32xf32> to vector<16xf32>
    %20 = vector.shape_cast %19 : vector<16xf32> to vector<16x1xf32>
    %cst_7 = arith.constant 0.000000e+00 : f32
    %21 = vector.broadcast %cst_7 : f32 to vector<16x1xf32>
    %22 = arith.select %13, %20, %21 : vector<16x1xi1>, vector<16x1xf32>
    %23 = arith.extui %13 : vector<16x1xi1> to vector<16x1xi32>
    %24 = arith.sitofp %23 : vector<16x1xi32> to vector<16x1xf32>
    %25 = tpu.concatenate %17, %22, %24 in 1 : vector<16x1xf32>, vector<16x1xf32>, vector<16x1xf32> -> vector<16x3xf32>
    %c0_8 = arith.constant 0 : index
    %c0_9 = arith.constant 0 : index
    %26 = vector.load %arg2[%c0_8, %c0_9] : memref<1x16xi32, #tpu.memory_space<vmem>>, vector<1x16xi32>
    %27 = tpu.iota {dimensions = array<i32: 0>} : vector<2x16xi32>
    %28 = vector.broadcast %26 : vector<1x16xi32> to vector<2x16xi32>
    %29 = arith.cmpi eq, %27, %28 : vector<2x16xi32>
    %30 = arith.extui %29 : vector<2x16xi1> to vector<2x16xi32>
    %31 = arith.sitofp %30 : vector<2x16xi32> to vector<2x16xf32>
    %cst_10 = arith.constant dense<0.000000e+00> : vector<2x3xf32>
    %32 = tpu.matmul %31, %25, %cst_10 {dimension_numbers = #tpu.dot_dimension_numbers<[1], [0], [0], [1], [0, 0, 1, 1], [], []>} : vector<2x16xf32>, vector<16x3xf32>, vector<2x3xf32> -> vector<2x3xf32>
    %33 = arith.addf %6, %32 : vector<2x3xf32>
    %c0_11 = arith.constant 0 : index
    %c0_12 = arith.constant 0 : index
    %c0_13 = arith.constant 0 : index
    %34 = vector.load %arg4[%c0_11, %c0_12, %c0_13] : memref<1x2x3xf32, #tpu.memory_space<vmem>>, vector<1x2x3xf32>
    %35 = vector.shape_cast %34 : vector<1x2x3xf32> to vector<2x3xf32>
    %36 = arith.addf %35, %33 : vector<2x3xf32>
    %c0_14 = arith.constant 0 : index
    %c0_15 = arith.constant 0 : index
    %c0_16 = arith.constant 0 : index
    %37 = vector.load %arg4[%c0_14, %c0_15, %c0_16] : memref<1x2x3xf32, #tpu.memory_space<vmem>>, vector<1x2x3xf32>
    %38 = vector.shape_cast %37 : vector<1x2x3xf32> to vector<2x3xf32>
    %39 = vector.shape_cast %36 : vector<2x3xf32> to vector<1x2x3xf32>
    tpu.vector_store %arg4[%c0_14, %c0_15, %c0_16], %39 {strides = array<i32>} : memref<1x2x3xf32, #tpu.memory_space<vmem>>, vector<1x2x3xf32>,
    return
  }
  func.func @transform_0(%arg0: i32, %arg1: i32) -> (i32, i32) {
    %c1_i32 = arith.constant 1 : i32
    %0 = arith.muli %arg0, %c1_i32 : i32
    %1 = arith.addi %0, %arg1 : i32
    %c0_i32 = arith.constant 0 : i32
    %2 = arith.minsi %1, %c0_i32 : i32
    %c0_i32_0 = arith.constant 0 : i32
    %c0_i32_1 = arith.constant 0 : i32
    return %c0_i32_0, %2 : i32, i32
  }
  func.func @transform_1(%arg0: i32, %arg1: i32) -> (i32, i32) {
    %c1_i32 = arith.constant 1 : i32
    %0 = arith.muli %arg0, %c1_i32 : i32
    %1 = arith.addi %0, %arg1 : i32
    %c0_i32 = arith.constant 0 : i32
    %2 = arith.minsi %1, %c0_i32 : i32
    %c0_i32_0 = arith.constant 0 : i32
    %c0_i32_1 = arith.constant 0 : i32
    return %2, %c0_i32_0 : i32, i32
  }
  func.func @transform_2(%arg0: i32, %arg1: i32) -> (i32, i32, i32) {
    %c0_i32 = arith.constant 0 : i32
    %c0_i32_0 = arith.constant 0 : i32
    %c0_i32_1 = arith.constant 0 : i32
    return %arg0, %c0_i32, %c0_i32_0 : i32, i32, i32
  }
}

</mosaic_0001>

<bundles_post_ra>
// kernel: tpu_custom_call.1
= control target key start
LH: loop header
LB: loop body
LE: loop exit
PB: predicated region body
PF: predicated region fallthrough
CT: control target
= control target key end

     0   :  { %7 = vsyncpa [#allocation3], 0  ;;  %s373_s0 = inlined_call_operand.hbm [shape: s32[1,16], index: 0, kind: input, shape index: {}]   ;;  %s374_s1 = inlined_call_operand.hbm [shape: f32[16,32], index: 1, kind: input, shape index: {}]   ;;  %s375_s2 = inlined_call_operand.hbm [shape: f32[1,2,3], index: 2, kind: output, shape index: {}]  }
   0x1   :  { %8 = vsyncpa [#allocation6], 0 }
   0x2   :  { %9 = vsyncpa [#allocation4], 0  ;;  %s305_s9 = smov [#allocation2]   ;;  %s306_s11 = smov [#allocation5]  }
   0x3   :  { %s21_s10 = sshll.u32 %s305_s9, 4  ;;  %s36_s12 = sshll.u32 %s306_s11, 4  ;;  %s22_s10 = int_to_ptr.vmem [resolvable:$true] %s21_s10  ;;  %s328_s12 = int_to_ptr.vmem [resolvable:$true] %s36_s12 }
   0x4   :  { %s233_s15 = scalar_lea.hbm %s373_s0, 16 }
   0x5   :  { %p234_p0 = scmp.ne.s32.totalorder %s373_s0, %s233_s15  ;;  %p237_p1 = scmp.lt.u32.totalorder %s233_s15, %s373_s0 }
   0x7   :  { %p239_p2 = pnand %p237_p1, %p234_p0 }
   0x9   :  { %242 = shalt.err (!%p239_p2)
}
   0xa   :  { %s243_s20 = scalar_lea.vmem %s22_s10, 16  ;;  %s247_s21 = scalar_lea.vmem %s22_s10, 32 }
   0xb   :  { %p244_p3 = scmp.ne.s32.totalorder %s22_s10, %s243_s20  ;;  %p248_p4 = scmp.lt.s32.totalorder %s22_s10, %s22_s10 }
   0xc   :  { %p249_p5 = scmp.lt.s32.totalorder %s247_s21, %s243_s20 }
   0xe   :  { %p250_p6 = por %p249_p5, %p248_p4 }
  0x10   :  { %p251_p7 = pnand %p250_p6, %p244_p3 }
  0x12   :  { %254 = shalt.err (!%p251_p7)
}
  0x13   :  { %24 = dma.hbm_to_vmem [thread:$0]  %s373_s0, 16, %s22_s10, [#allocation3]  }
  0x14   :  { %s255_s26 = scalar_lea.hbm %s374_s1, 256 }
  0x15   :  { %p256_p8 = scmp.ne.s32.totalorder %s374_s1, %s255_s26  ;;  %p259_p9 = scmp.lt.u32.totalorder %s255_s26, %s374_s1 }
  0x17   :  { %p261_p10 = pnand %p259_p9, %p256_p8 }
  0x19   :  { %264 = shalt.err (!%p261_p10)
}
  0x1a   :  { %s265_s3 = scalar_lea.vmem %s328_s12, 256  ;;  %p270_p12 = scmp.lt.s32.totalorder %s328_s12, %s328_s12 }
  0x1b   :  { %p266_p11 = scmp.ne.s32.totalorder %s328_s12, %s265_s3  ;;  %p271_p13 = scmp.lt.s32.totalorder %s265_s3, %s265_s3 }
  0x1d   :  { %p272_p0 = por %p271_p13, %p270_p12 }
  0x1f   :  { %p273_p1 = pnand %p272_p0, %p266_p11 }
  0x21   :  { %276 = shalt.err (!%p273_p1)
}
  0x22   :  { %s307_s0 = smov 128   ;;  %s308_s4 = smov 8  }
  0x23   :  { %42 = dma.hbm_to_vmem [thread:$0]  %s374_s1, 256, %s328_s12, [#allocation6], %s307_s0, %s307_s0, %s308_s4  }
  0x24   :  { %299 = dma.done.wait [#allocation3], 16  }
  0x25   :  { %300 = vsyncadd [#allocation3], 4294967280 }
  0x26   :  { %301 = dma.done.wait [#allocation6], 256  }
  0x27   :  { %302 = vsyncadd [#allocation6], 4294967040  ;;  %vm74_vm0 = vcmask 261120   ;;  %v64_v0 = vld [vmem:[#allocation5] sm:$0xff]  ;;  %v65_v1 = vld [vmem:[#allocation5 + $0x8] sm:$0xff]  ;;  %v309_v8 = vmov 0.0|0.0   ;;  %v66_v11 = vlaneseq }
  0x28   :  { %v83_v2 = vmul.f32 %v64_v0, %v64_v0  ;;  %v75_v3 = vsel %vm74_vm0, %v64_v0, 0.0  ;;  %v84_v4 = vmul.f32 %v65_v1, %v65_v1  ;;  %v78_v6 = vsel %vm74_vm0, %v65_v1, 0.0  ;;  %222 = vmatprep.subr.bf16.mxu0 %v309_v8  ;;  %v209_v16 = vld [vmem:[#allocation2] ss:$0 sm:$0xff]  ;;  %s312_s1 = smov [#allocation7]  }
  0x29   :  { %76 = vadd.xlane.f32.xlu0 %v75_v3  ;;  %vm60_vm1 = vcmask 17408   ;;  %v310_v9 = vmov 0.0   ;;  %vm311_vm2 = vmmov 0   ;;  %vm97_vm3 = vcmask 7168   ;;  %s195_s7 = sshll.u32 %s312_s1, 4  ;;  %s196_s7 = int_to_ptr.vmem [resolvable:$true] %s195_s7 }
  0x2a   :  { %v85_v5 = vsel %vm74_vm0, %v83_v2, 0.0  ;;  %v88_v7 = vsel %vm74_vm0, %v84_v4, 0.0  ;;  %61 = vst.msk [vmem:[#allocation7] sm:$0x3] %vm60_vm1, %v310_v9  ;;  %219 = vmatprep.mubr.msk.f32.mxu0 %vm311_vm2, %v310_v9  ;;  %v67_v14 = vshrl.u32 %v66_v11, 7  ;;  %vm100_vm4 = vcmask 15360   ;;  %p282_p3 = scmp.lt.s32.totalorder %s196_s7, %s196_s7 }
  0x2b   :  { %86 = vadd.xlane.f32.xlu1 %v85_v5  ;;  %vm111_vm6 = vcmask 130048   ;;  %s277_s8 = scalar_lea.vmem %s196_s7, 32 }
  0x2c   :  { %vm108_vm5 = vcmp.eq.s32.totalorder %v67_v14, %v209_v16  ;;  %p278_p2 = scmp.ne.s32.totalorder %s196_s7, %s277_s8  ;;  %p283_p4 = scmp.lt.s32.totalorder %s277_s8, %s277_s8 }
  0x2d   :  { %79 = vadd.xlane.f32.xlu0 %v78_v6  ;;  %v210_v22 = vsel %vm108_vm5, 1.0, %v310_v9 }
  0x2e   :  { %p284_p5 = por %p283_p4, %p282_p3 }
  0x2f   :  { %89 = vadd.xlane.f32.xlu1 %v88_v7 }
  0x30   :  { %p285_p6 = pnand %p284_p5, %p278_p2 }
  0x31   :  { %v185_v23 = vld [vmem:[#allocation7] sm:$0x3] }
  0xb6   :  { %v77_v10 = vpop.xlane.xlu0 %76 }
  0xb8   :  { %v87_v12 = vpop.xlane.xlu1 %86 }
  0xb9   :  { %v98_v15 = vsel %vm97_vm3, %v77_v10, %v87_v12 }
  0xba   :  { %v80_v13 = vpop.xlane.xlu0 %79  ;;  %v101_v19 = vsel %vm100_vm4, %v98_v15, 1.0 }
  0xbc   :  { %v90_v17 = vpop.xlane.xlu1 %89 }
  0xbd   :  { %v99_v18 = vsel %vm97_vm3, %v80_v13, %v90_v17 }
  0xbe   :  { %v102_v20 = vsel %vm100_vm4, %v99_v18, 1.0 }
  0xbf   :  { %v223_v21 = vpack.c.bf16 %v102_v20, %v101_v19 }
  0xc1   :  { %224 = vmatpush3.bf16.msra.mxu0 %v223_v21 }
  0xc4   :  { %220 = vmatmul.mubr.msk.f32.vlgmr.msra.gmra.mrb[0].mxu0 %vm111_vm6, %v210_v22 }
 0x197   :  { %v181_v24 = vpop.f32.mrb[0].mxu0 }
 0x198   :  { %v186_v25 = vadd.f32 %v185_v23, %v181_v24  ;;  %v221_v26 = vpop.f32.mrb[1].mxu0 }
 0x19a   :  { %188 = vst.msk [vmem:[#allocation7] sm:$0x3] %vm60_vm1, %v186_v25 }
 0x19b   :  { %288 = shalt.err (!%p285_p6)
}
 0x19c   :  { %s289_s11 = scalar_lea.hbm %s375_s2, 32 }
 0x19d   :  { %p290_p7 = scmp.ne.s32.totalorder %s375_s2, %s289_s11  ;;  %p293_p8 = scmp.lt.u32.totalorder %s289_s11, %s375_s2 }
 0x19f   :  { %p295_p9 = pnand %p293_p8, %p290_p7 }
 0x1a1   :  { %298 = shalt.err (!%p295_p9)
}
 0x1a2   :  { %198 = dma.vmem_to_hbm [thread:$0]  %s196_s7, 32, %s375_s2, [#allocation4]  }
 0x1a3   :  { %303 = dma.done.wait [#allocation4], 32  }
 0x1a4   :  { %304 = vsyncadd [#allocation4], 4294967264 }
 0x1a5   :  { %202 = vsyncpa [#allocation3], 1 }
 0x1a6   :  { %203 = vsyncpa [#allocation6], 1 }
 0x1a7   :  { %204 = vsyncpa [#allocation4], 1 }

</bundles_post_ra>
